<compile_context>
chip_gen: v5e
topology: v5e:2x2
jax: 0.10.0
libtpu: 0.0.40
codegen_flags: <defaults>
</compile_context>

<pallas_src>
import functools

import jax
import jax.numpy as jnp
from jax import lax
from jax.experimental import pallas as pl
from jax.experimental.pallas import tpu as pltpu

LN_EPS = 1e-5  # nn.LayerNorm default


# ----------------------------- kernel ------------------------------------- #
def prenorm_residual_kernel(
    x_ref, g_ref, beta_ref, w1_ref, b1_ref, w2_ref, b2_ref, o_ref,
    *, mxu_dtype, h_chunk,
):
    # ---- LayerNorm over the feature (last) dim, f32 math, one-pass stats ----
    x = x_ref[...].astype(jnp.float32)                      # (TM, D)
    d = x.shape[-1]
    s1 = jnp.sum(x, axis=-1, keepdims=True)                 # (TM, 1)
    s2 = jnp.sum(x * x, axis=-1, keepdims=True)             # (TM, 1)
    mean = s1 * (1.0 / d)
    var = s2 * (1.0 / d) - mean * mean                      # E[x^2] - mean^2
    inv = lax.rsqrt(var + LN_EPS)                           # EUP
    xn = ((x - mean) * inv) * g_ref[...] + beta_ref[...]    # (TM, D)
    xn_mx = xn.astype(mxu_dtype)                            # bf16 MXU operand

    # ---- fn = FeedForward: Linear -> GELU -> Linear, chunked over H ---------
    hdim = w1_ref.shape[-1]
    n_chunks = hdim // h_chunk
    y = None                                                # (TM, D) f32 acc
    for c in range(n_chunks):                               # static unroll
        off = c * h_chunk
        h = jnp.dot(xn_mx, w1_ref[:, pl.ds(off, h_chunk)],
                    preferred_element_type=jnp.float32)     # (TM, TH)
        h = h + b1_ref[:, pl.ds(off, h_chunk)]
        h = jax.nn.gelu(h)                                  # tanh-approx GELU
        yc = jnp.dot(h.astype(mxu_dtype), w2_ref[pl.ds(off, h_chunk), :],
                     preferred_element_type=jnp.float32)    # (TM, D)
        y = yc if y is None else y + yc

    # ---- bias + residual add + store ----------------------------------------
    o_ref[...] = (y + b2_ref[...] + x).astype(o_ref.dtype)


# --------------------------- tiling policy --------------------------------- #
def _vmem_limit_bytes():
    """~75% of physical VMEM: ~48 MiB on v7x (64 MiB/TC), ~96 MiB on v5e/v6e."""
    try:
        cap = int(pltpu.get_tpu_info().vmem_capacity_bytes)
    except Exception:
        cap = 128 << 20
    return min((cap * 3) // 4, 100 << 20)


def _pick_tm(M, D, H, x_bytes, w_bytes, budget):
    """Largest row-tile (multiple of 8) whose working set fits the VMEM budget."""
    # Weights counted twice (safe if the Buffered(1) fallback double-buffers).
    fixed = 2 * (2 * D * H) * w_bytes + 16 * (3 * D + H)
    # Per row: double-buffered in+out tiles + f32 temps (x, xn, y) + f32 hidden.
    per_row = 4 * D * x_bytes + 4 * H + 16 * D
    tm_cap = max(8, (budget - fixed) // per_row)
    if M > 8:
        # Prefer >=2 grid steps so v7x's two TensorCores both get work.
        tm_cap = min(tm_cap, max(8, ((M + 15) // 16) * 8))
    for tm in (1024, 512, 256, 128, 64, 32, 16, 8):
        if tm <= tm_cap:
            return tm
    return 8


def _pick_h_chunk(TM, H, budget):
    """Bound the (TM, TH) f32 hidden intermediate (matters for large H on v7x)."""
    th = H
    while th % 2 == 0 and th >= 512 and TM * th * 4 > budget // 8:
        th //= 2
    return th


# ----------------------------- wrapper ------------------------------------- #
def prenorm_residual(x, gamma, beta, w1, b1, w2, b2, *, mxu_dtype=jnp.bfloat16):
    """x: (B, N, D); gamma/beta: (D,); w1: (D, H); b1: (H,); w2: (H, D); b2: (D,)."""
    B, N, D = x.shape
    H = w1.shape[1]
    M = B * N
    x2d = x.reshape(M, D)

    # bf16 MXU operands: halves weight HBM/VMEM bytes, ~2x MXU throughput.
    w1c = w1.astype(mxu_dtype)
    w2c = w2.astype(mxu_dtype)
    # LN params / biases stay f32 (added to f32 accumulators), lane-major (1, D).
    g2 = gamma.reshape(1, D).astype(jnp.float32)
    be2 = beta.reshape(1, D).astype(jnp.float32)
    b1_2 = b1.reshape(1, H).astype(jnp.float32)
    b2_2 = b2.reshape(1, D).astype(jnp.float32)

    vmem_limit = _vmem_limit_bytes()
    budget = (vmem_limit * 4) // 5
    TM = _pick_tm(M, D, H, x.dtype.itemsize, jnp.dtype(mxu_dtype).itemsize, budget)
    TH = _pick_h_chunk(TM, H, budget)

    # Pad M up to a multiple of TM (no more "whole problem in one step" fallback).
    M_pad = ((M + TM - 1) // TM) * TM
    if M_pad != M:
        x2d = jnp.pad(x2d, ((0, M_pad - M), (0, 0)))
    grid = (M_pad // TM,)

    kernel = functools.partial(prenorm_residual_kernel,
                               mxu_dtype=mxu_dtype, h_chunk=TH)

    def _run(param_mode):
        rep = lambda i: (0, 0)   # grid-invariant parameter blocks

        def pspec(shape):
            return pl.BlockSpec(shape, rep, pipeline_mode=param_mode)

        return pl.pallas_call(
            kernel,
            out_shape=jax.ShapeDtypeStruct((M_pad, D), x.dtype),
            grid_spec=pltpu.PrefetchScalarGridSpec(
                num_scalar_prefetch=0,
                grid=grid,
                in_specs=[
                    pl.BlockSpec((TM, D), lambda i: (i, 0)),  # x tile
                    pspec((1, D)),                            # gamma
                    pspec((1, D)),                            # beta
                    pspec((D, H)),                            # W1 (D_in, D_out)
                    pspec((1, H)),                            # b1
                    pspec((H, D)),                            # W2 (D_in, D_out)
                    pspec((1, D)),                            # b2
                ],
                out_specs=pl.BlockSpec((TM, D), lambda i: (i, 0)),
            ),
            compiler_params=pltpu.CompilerParams(
                dimension_semantics=("parallel",),   # M tiles are independent
                vmem_limit_bytes=vmem_limit,
            ),
        )(x2d, g2, be2, w1c, b1_2, w2c, b2_2)

    try:
        # Single-buffer the grid-invariant params (same block every step) so
        # W1/W2 are not double-counted against VMEM.
        out2d = jax.block_until_ready(_run(pl.Buffered(1)))
    except Exception:
        # Fallback for JAX versions without top-level pipeline_mode support.
        out2d = _run(None)

    if M_pad != M:
        out2d = out2d[:M]
    return out2d.reshape(B, N, D)


# ---------------------------- reference ------------------------------------ #
def _reference(x, gamma, beta, w1, b1, w2, b2, mxu_dtype=jnp.bfloat16):
    xf = x.astype(jnp.float32)
    mean = xf.mean(-1, keepdims=True)
    var = ((xf - mean) ** 2).mean(-1, keepdims=True)
    xn = (xf - mean) / jnp.sqrt(var + LN_EPS) * gamma + beta
    h = jnp.dot(xn.astype(mxu_dtype), w1.astype(mxu_dtype),
                preferred_element_type=jnp.float32) + b1
    h = jax.nn.gelu(h)   # same tanh-approx GELU as the kernel
    y = jnp.dot(h.astype(mxu_dtype), w2.astype(mxu_dtype),
                preferred_element_type=jnp.float32) + b2
    return (y + xf).astype(x.dtype)


if __name__ == "__main__":
    # Small shapes: batch=2, seq=8, dim=32, hidden=4*dim=128.
    B, N, D = 2, 8, 32
    H = 4 * D

    key = jax.random.PRNGKey(0)
    kx, kg, kb, kw1, kb1, kw2, kb2 = jax.random.split(key, 7)
    x = jax.random.normal(kx, (B, N, D), dtype=jnp.float32)
    gamma = 1.0 + 0.05 * jax.random.normal(kg, (D,), dtype=jnp.float32)
    beta = 0.05 * jax.random.normal(kb, (D,), dtype=jnp.float32)
    # Weights stored in (D_in, D_out) layout (already "pre-transposed" for MXU).
    w1 = 0.05 * jax.random.normal(kw1, (D, H), dtype=jnp.float32)
    b1 = 0.05 * jax.random.normal(kb1, (H,), dtype=jnp.float32)
    w2 = 0.05 * jax.random.normal(kw2, (H, D), dtype=jnp.float32)
    b2 = 0.05 * jax.random.normal(kb2, (D,), dtype=jnp.float32)

    out = prenorm_residual(x, gamma, beta, w1, b1, w2, b2)
    out = jax.block_until_ready(out)

    ref = _reference(x, gamma, beta, w1, b1, w2, b2)
    assert out.shape == x.shape
    assert jnp.allclose(out, ref, atol=1e-2, rtol=1e-2), "mismatch vs reference"

    print("KERNEL_OK")
</pallas_src>

<mosaic_0001>
module attributes {stable_mosaic.version = 11 : i64} {
  func.func @prenorm_residual_kernel(%arg0: i32, %arg1: memref<8x32xf32, #tpu.memory_space<vmem>>, %arg2: memref<1x32xf32, #tpu.memory_space<vmem>>, %arg3: memref<1x32xf32, #tpu.memory_space<vmem>>, %arg4: memref<32x128xbf16, #tpu.memory_space<vmem>>, %arg5: memref<1x128xf32, #tpu.memory_space<vmem>>, %arg6: memref<128x32xbf16, #tpu.memory_space<vmem>>, %arg7: memref<1x32xf32, #tpu.memory_space<vmem>>, %arg8: memref<8x32xf32, #tpu.memory_space<vmem>>) attributes {dimension_semantics = [#tpu.dimension_semantics<parallel>], iteration_bounds = array<i64: 2>, scalar_prefetch = 0 : i64, scratch_operands = 0 : i64, tpu.core_type = #tpu.core_type<tc>, window_params = [{transform_indices = @transform_0, window_bounds = array<i64: 8, 32>}, {pipeline_mode = #tpu.pipeline_mode<synchronous>, transform_indices = @transform_1, window_bounds = array<i64: 1, 32>}, {pipeline_mode = #tpu.pipeline_mode<synchronous>, transform_indices = @transform_2, window_bounds = array<i64: 1, 32>}, {pipeline_mode = #tpu.pipeline_mode<synchronous>, transform_indices = @transform_3, window_bounds = array<i64: 32, 128>}, {pipeline_mode = #tpu.pipeline_mode<synchronous>, transform_indices = @transform_4, window_bounds = array<i64: 1, 128>}, {pipeline_mode = #tpu.pipeline_mode<synchronous>, transform_indices = @transform_5, window_bounds = array<i64: 128, 32>}, {pipeline_mode = #tpu.pipeline_mode<synchronous>, transform_indices = @transform_6, window_bounds = array<i64: 1, 32>}, {transform_indices = @transform_7, window_bounds = array<i64: 8, 32>}]} {
    %c0 = arith.constant 0 : index
    %c0_0 = arith.constant 0 : index
    %0 = vector.load %arg1[%c0, %c0_0] : memref<8x32xf32, #tpu.memory_space<vmem>>, vector<8x32xf32>
    %cst = arith.constant dense<0.000000e+00> : vector<8xf32>
    %1 = vector.multi_reduction <add>, %0, %cst [1] : vector<8x32xf32> to vector<8xf32>
    %2 = vector.shape_cast %1 : vector<8xf32> to vector<8x1xf32>
    %3 = arith.mulf %0, %0 : vector<8x32xf32>
    %cst_1 = arith.constant dense<0.000000e+00> : vector<8xf32>
    %4 = vector.multi_reduction <add>, %3, %cst_1 [1] : vector<8x32xf32> to vector<8xf32>
    %5 = vector.shape_cast %4 : vector<8xf32> to vector<8x1xf32>
    %cst_2 = arith.constant 3.125000e-02 : f32
    %6 = vector.broadcast %cst_2 : f32 to vector<8x1xf32>
    %7 = arith.mulf %2, %6 : vector<8x1xf32>
    %cst_3 = arith.constant 3.125000e-02 : f32
    %8 = vector.broadcast %cst_3 : f32 to vector<8x1xf32>
    %9 = arith.mulf %5, %8 : vector<8x1xf32>
    %10 = arith.mulf %7, %7 : vector<8x1xf32>
    %11 = arith.subf %9, %10 : vector<8x1xf32>
    %cst_4 = arith.constant 9.99999974E-6 : f32
    %12 = vector.broadcast %cst_4 : f32 to vector<8x1xf32>
    %13 = arith.addf %11, %12 : vector<8x1xf32>
    %14 = math.rsqrt %13 : vector<8x1xf32>
    %15 = vector.broadcast %7 : vector<8x1xf32> to vector<8x32xf32>
    %16 = arith.subf %0, %15 : vector<8x32xf32>
    %17 = vector.broadcast %14 : vector<8x1xf32> to vector<8x32xf32>
    %18 = arith.mulf %16, %17 : vector<8x32xf32>
    %c0_5 = arith.constant 0 : index
    %c0_6 = arith.constant 0 : index
    %19 = vector.load %arg2[%c0_5, %c0_6] : memref<1x32xf32, #tpu.memory_space<vmem>>, vector<1x32xf32>
    %20 = vector.broadcast %19 : vector<1x32xf32> to vector<8x32xf32>
    %21 = arith.mulf %18, %20 : vector<8x32xf32>
    %c0_7 = arith.constant 0 : index
    %c0_8 = arith.constant 0 : index
    %22 = vector.load %arg3[%c0_7, %c0_8] : memref<1x32xf32, #tpu.memory_space<vmem>>, vector<1x32xf32>
    %23 = vector.broadcast %22 : vector<1x32xf32> to vector<8x32xf32>
    %24 = arith.addf %21, %23 : vector<8x32xf32>
    %25 = arith.truncf %24 : vector<8x32xf32> to vector<8x32xbf16>
    %c0_9 = arith.constant 0 : index
    %c0_10 = arith.constant 0 : index
    %26 = vector.load %arg4[%c0_9, %c0_10] : memref<32x128xbf16, #tpu.memory_space<vmem>>, vector<32x128xbf16>
    %cst_11 = arith.constant dense<0.000000e+00> : vector<8x128xf32>
    %27 = tpu.matmul %25, %26, %cst_11 {dimension_numbers = #tpu.dot_dimension_numbers<[1], [0], [0], [1], [0, 0, 1, 1], [], []>} : vector<8x32xbf16>, vector<32x128xbf16>, vector<8x128xf32> -> vector<8x128xf32>
    %c0_12 = arith.constant 0 : index
    %c0_13 = arith.constant 0 : index
    %28 = vector.load %arg5[%c0_12, %c0_13] : memref<1x128xf32, #tpu.memory_space<vmem>>, vector<1x128xf32>
    %29 = vector.broadcast %28 : vector<1x128xf32> to vector<8x128xf32>
    %30 = arith.addf %27, %29 : vector<8x128xf32>
    %31 = arith.mulf %30, %30 : vector<8x128xf32>
    %32 = arith.mulf %30, %31 : vector<8x128xf32>
    %cst_14 = arith.constant 4.471500e-02 : f32
    %33 = vector.broadcast %cst_14 : f32 to vector<8x128xf32>
    %34 = arith.mulf %33, %32 : vector<8x128xf32>
    %35 = arith.addf %30, %34 : vector<8x128xf32>
    %cst_15 = arith.constant 0.797884583 : f32
    %36 = vector.broadcast %cst_15 : f32 to vector<8x128xf32>
    %37 = arith.mulf %36, %35 : vector<8x128xf32>
    %38 = math.tanh %37 : vector<8x128xf32>
    %cst_16 = arith.constant 1.000000e+00 : f32
    %39 = vector.broadcast %cst_16 : f32 to vector<8x128xf32>
    %40 = arith.addf %39, %38 : vector<8x128xf32>
    %cst_17 = arith.constant 5.000000e-01 : f32
    %41 = vector.broadcast %cst_17 : f32 to vector<8x128xf32>
    %42 = arith.mulf %41, %40 : vector<8x128xf32>
    %43 = arith.mulf %30, %42 : vector<8x128xf32>
    %44 = arith.truncf %43 : vector<8x128xf32> to vector<8x128xbf16>
    %c0_18 = arith.constant 0 : index
    %c0_19 = arith.constant 0 : index
    %45 = vector.load %arg6[%c0_18, %c0_19] : memref<128x32xbf16, #tpu.memory_space<vmem>>, vector<128x32xbf16>
    %cst_20 = arith.constant dense<0.000000e+00> : vector<8x32xf32>
    %46 = tpu.matmul %44, %45, %cst_20 {dimension_numbers = #tpu.dot_dimension_numbers<[1], [0], [0], [1], [0, 0, 1, 1], [], []>} : vector<8x128xbf16>, vector<128x32xbf16>, vector<8x32xf32> -> vector<8x32xf32>
    %c0_21 = arith.constant 0 : index
    %c0_22 = arith.constant 0 : index
    %47 = vector.load %arg7[%c0_21, %c0_22] : memref<1x32xf32, #tpu.memory_space<vmem>>, vector<1x32xf32>
    %48 = vector.broadcast %47 : vector<1x32xf32> to vector<8x32xf32>
    %49 = arith.addf %46, %48 : vector<8x32xf32>
    %50 = arith.addf %49, %0 : vector<8x32xf32>
    %c0_23 = arith.constant 0 : index
    %c0_24 = arith.constant 0 : index
    %51 = vector.load %arg8[%c0_23, %c0_24] : memref<8x32xf32, #tpu.memory_space<vmem>>, vector<8x32xf32>
    tpu.vector_store %arg8[%c0_23, %c0_24], %50 {strides = array<i32>} : memref<8x32xf32, #tpu.memory_space<vmem>>, vector<8x32xf32>,
    return
  }
  func.func @transform_0(%arg0: i32) -> (i32, i32) {
    %c0_i32 = arith.constant 0 : i32
    %c0_i32_0 = arith.constant 0 : i32
    return %arg0, %c0_i32 : i32, i32
  }
  func.func @transform_1(%arg0: i32) -> (i32, i32) {
    %c0_i32 = arith.constant 0 : i32
    %c0_i32_0 = arith.constant 0 : i32
    %c0_i32_1 = arith.constant 0 : i32
    return %c0_i32, %c0_i32_0 : i32, i32
  }
  func.func @transform_2(%arg0: i32) -> (i32, i32) {
    %c0_i32 = arith.constant 0 : i32
    %c0_i32_0 = arith.constant 0 : i32
    %c0_i32_1 = arith.constant 0 : i32
    return %c0_i32, %c0_i32_0 : i32, i32
  }
  func.func @transform_3(%arg0: i32) -> (i32, i32) {
    %c0_i32 = arith.constant 0 : i32
    %c0_i32_0 = arith.constant 0 : i32
    %c0_i32_1 = arith.constant 0 : i32
    return %c0_i32, %c0_i32_0 : i32, i32
  }
  func.func @transform_4(%arg0: i32) -> (i32, i32) {
    %c0_i32 = arith.constant 0 : i32
    %c0_i32_0 = arith.constant 0 : i32
    %c0_i32_1 = arith.constant 0 : i32
    return %c0_i32, %c0_i32_0 : i32, i32
  }
  func.func @transform_5(%arg0: i32) -> (i32, i32) {
    %c0_i32 = arith.constant 0 : i32
    %c0_i32_0 = arith.constant 0 : i32
    %c0_i32_1 = arith.constant 0 : i32
    return %c0_i32, %c0_i32_0 : i32, i32
  }
  func.func @transform_6(%arg0: i32) -> (i32, i32) {
    %c0_i32 = arith.constant 0 : i32
    %c0_i32_0 = arith.constant 0 : i32
    %c0_i32_1 = arith.constant 0 : i32
    return %c0_i32, %c0_i32_0 : i32, i32
  }
  func.func @transform_7(%arg0: i32) -> (i32, i32) {
    %c0_i32 = arith.constant 0 : i32
    %c0_i32_0 = arith.constant 0 : i32
    return %arg0, %c0_i32 : i32, i32
  }
}

module attributes {stable_mosaic.version = 11 : i64} {
  func.func @prenorm_residual_kernel(%arg0: i32, %arg1: memref<8x32xf32, #tpu.memory_space<vmem>>, %arg2: memref<1x32xf32, #tpu.memory_space<vmem>>, %arg3: memref<1x32xf32, #tpu.memory_space<vmem>>, %arg4: memref<32x128xbf16, #tpu.memory_space<vmem>>, %arg5: memref<1x128xf32, #tpu.memory_space<vmem>>, %arg6: memref<128x32xbf16, #tpu.memory_space<vmem>>, %arg7: memref<1x32xf32, #tpu.memory_space<vmem>>, %arg8: memref<8x32xf32, #tpu.memory_space<vmem>>) attributes {dimension_semantics = [#tpu.dimension_semantics<parallel>], iteration_bounds = array<i64: 2>, scalar_prefetch = 0 : i64, scratch_operands = 0 : i64, tpu.core_type = #tpu.core_type<tc>, window_params = [{transform_indices = @transform_0, window_bounds = array<i64: 8, 32>}, {pipeline_mode = #tpu.pipeline_mode<synchronous>, transform_indices = @transform_1, window_bounds = array<i64: 1, 32>}, {pipeline_mode = #tpu.pipeline_mode<synchronous>, transform_indices = @transform_2, window_bounds = array<i64: 1, 32>}, {pipeline_mode = #tpu.pipeline_mode<synchronous>, transform_indices = @transform_3, window_bounds = array<i64: 32, 128>}, {pipeline_mode = #tpu.pipeline_mode<synchronous>, transform_indices = @transform_4, window_bounds = array<i64: 1, 128>}, {pipeline_mode = #tpu.pipeline_mode<synchronous>, transform_indices = @transform_5, window_bounds = array<i64: 128, 32>}, {pipeline_mode = #tpu.pipeline_mode<synchronous>, transform_indices = @transform_6, window_bounds = array<i64: 1, 32>}, {transform_indices = @transform_7, window_bounds = array<i64: 8, 32>}]} {
    %c0 = arith.constant 0 : index
    %c0_0 = arith.constant 0 : index
    %0 = vector.load %arg1[%c0, %c0_0] : memref<8x32xf32, #tpu.memory_space<vmem>>, vector<8x32xf32>
    %cst = arith.constant dense<0.000000e+00> : vector<8xf32>
    %1 = vector.multi_reduction <add>, %0, %cst [1] : vector<8x32xf32> to vector<8xf32>
    %2 = vector.shape_cast %1 : vector<8xf32> to vector<8x1xf32>
    %3 = arith.mulf %0, %0 : vector<8x32xf32>
    %cst_1 = arith.constant dense<0.000000e+00> : vector<8xf32>
    %4 = vector.multi_reduction <add>, %3, %cst_1 [1] : vector<8x32xf32> to vector<8xf32>
    %5 = vector.shape_cast %4 : vector<8xf32> to vector<8x1xf32>
    %cst_2 = arith.constant 3.125000e-02 : f32
    %6 = vector.broadcast %cst_2 : f32 to vector<8x1xf32>
    %7 = arith.mulf %2, %6 : vector<8x1xf32>
    %cst_3 = arith.constant 3.125000e-02 : f32
    %8 = vector.broadcast %cst_3 : f32 to vector<8x1xf32>
    %9 = arith.mulf %5, %8 : vector<8x1xf32>
    %10 = arith.mulf %7, %7 : vector<8x1xf32>
    %11 = arith.subf %9, %10 : vector<8x1xf32>
    %cst_4 = arith.constant 9.99999974E-6 : f32
    %12 = vector.broadcast %cst_4 : f32 to vector<8x1xf32>
    %13 = arith.addf %11, %12 : vector<8x1xf32>
    %14 = math.rsqrt %13 : vector<8x1xf32>
    %15 = vector.broadcast %7 : vector<8x1xf32> to vector<8x32xf32>
    %16 = arith.subf %0, %15 : vector<8x32xf32>
    %17 = vector.broadcast %14 : vector<8x1xf32> to vector<8x32xf32>
    %18 = arith.mulf %16, %17 : vector<8x32xf32>
    %c0_5 = arith.constant 0 : index
    %c0_6 = arith.constant 0 : index
    %19 = vector.load %arg2[%c0_5, %c0_6] : memref<1x32xf32, #tpu.memory_space<vmem>>, vector<1x32xf32>
    %20 = vector.broadcast %19 : vector<1x32xf32> to vector<8x32xf32>
    %21 = arith.mulf %18, %20 : vector<8x32xf32>
    %c0_7 = arith.constant 0 : index
    %c0_8 = arith.constant 0 : index
    %22 = vector.load %arg3[%c0_7, %c0_8] : memref<1x32xf32, #tpu.memory_space<vmem>>, vector<1x32xf32>
    %23 = vector.broadcast %22 : vector<1x32xf32> to vector<8x32xf32>
    %24 = arith.addf %21, %23 : vector<8x32xf32>
    %25 = arith.truncf %24 : vector<8x32xf32> to vector<8x32xbf16>
    %c0_9 = arith.constant 0 : index
    %c0_10 = arith.constant 0 : index
    %26 = vector.load %arg4[%c0_9, %c0_10] : memref<32x128xbf16, #tpu.memory_space<vmem>>, vector<32x128xbf16>
    %cst_11 = arith.constant dense<0.000000e+00> : vector<8x128xf32>
    %27 = tpu.matmul %25, %26, %cst_11 {dimension_numbers = #tpu.dot_dimension_numbers<[1], [0], [0], [1], [0, 0, 1, 1], [], []>} : vector<8x32xbf16>, vector<32x128xbf16>, vector<8x128xf32> -> vector<8x128xf32>
    %c0_12 = arith.constant 0 : index
    %c0_13 = arith.constant 0 : index
    %28 = vector.load %arg5[%c0_12, %c0_13] : memref<1x128xf32, #tpu.memory_space<vmem>>, vector<1x128xf32>
    %29 = vector.broadcast %28 : vector<1x128xf32> to vector<8x128xf32>
    %30 = arith.addf %27, %29 : vector<8x128xf32>
    %31 = arith.mulf %30, %30 : vector<8x128xf32>
    %32 = arith.mulf %30, %31 : vector<8x128xf32>
    %cst_14 = arith.constant 4.471500e-02 : f32
    %33 = vector.broadcast %cst_14 : f32 to vector<8x128xf32>
    %34 = arith.mulf %33, %32 : vector<8x128xf32>
    %35 = arith.addf %30, %34 : vector<8x128xf32>
    %cst_15 = arith.constant 0.797884583 : f32
    %36 = vector.broadcast %cst_15 : f32 to vector<8x128xf32>
    %37 = arith.mulf %36, %35 : vector<8x128xf32>
    %38 = math.tanh %37 : vector<8x128xf32>
    %cst_16 = arith.constant 1.000000e+00 : f32
    %39 = vector.broadcast %cst_16 : f32 to vector<8x128xf32>
    %40 = arith.addf %39, %38 : vector<8x128xf32>
    %cst_17 = arith.constant 5.000000e-01 : f32
    %41 = vector.broadcast %cst_17 : f32 to vector<8x128xf32>
    %42 = arith.mulf %41, %40 : vector<8x128xf32>
    %43 = arith.mulf %30, %42 : vector<8x128xf32>
    %44 = arith.truncf %43 : vector<8x128xf32> to vector<8x128xbf16>
    %c0_18 = arith.constant 0 : index
    %c0_19 = arith.constant 0 : index
    %45 = vector.load %arg6[%c0_18, %c0_19] : memref<128x32xbf16, #tpu.memory_space<vmem>>, vector<128x32xbf16>
    %cst_20 = arith.constant dense<0.000000e+00> : vector<8x32xf32>
    %46 = tpu.matmul %44, %45, %cst_20 {dimension_numbers = #tpu.dot_dimension_numbers<[1], [0], [0], [1], [0, 0, 1, 1], [], []>} : vector<8x128xbf16>, vector<128x32xbf16>, vector<8x32xf32> -> vector<8x32xf32>
    %c0_21 = arith.constant 0 : index
    %c0_22 = arith.constant 0 : index
    %47 = vector.load %arg7[%c0_21, %c0_22] : memref<1x32xf32, #tpu.memory_space<vmem>>, vector<1x32xf32>
    %48 = vector.broadcast %47 : vector<1x32xf32> to vector<8x32xf32>
    %49 = arith.addf %46, %48 : vector<8x32xf32>
    %50 = arith.addf %49, %0 : vector<8x32xf32>
    %c0_23 = arith.constant 0 : index
    %c0_24 = arith.constant 0 : index
    %51 = vector.load %arg8[%c0_23, %c0_24] : memref<8x32xf32, #tpu.memory_space<vmem>>, vector<8x32xf32>
    tpu.vector_store %arg8[%c0_23, %c0_24], %50 {strides = array<i32>} : memref<8x32xf32, #tpu.memory_space<vmem>>, vector<8x32xf32>,
    return
  }
  func.func @transform_0(%arg0: i32) -> (i32, i32) {
    %c0_i32 = arith.constant 0 : i32
    %c0_i32_0 = arith.constant 0 : i32
    return %arg0, %c0_i32 : i32, i32
  }
  func.func @transform_1(%arg0: i32) -> (i32, i32) {
    %c0_i32 = arith.constant 0 : i32
    %c0_i32_0 = arith.constant 0 : i32
    %c0_i32_1 = arith.constant 0 : i32
    return %c0_i32, %c0_i32_0 : i32, i32
  }
  func.func @transform_2(%arg0: i32) -> (i32, i32) {
    %c0_i32 = arith.constant 0 : i32
    %c0_i32_0 = arith.constant 0 : i32
    %c0_i32_1 = arith.constant 0 : i32
    return %c0_i32, %c0_i32_0 : i32, i32
  }
  func.func @transform_3(%arg0: i32) -> (i32, i32) {
    %c0_i32 = arith.constant 0 : i32
    %c0_i32_0 = arith.constant 0 : i32
    %c0_i32_1 = arith.constant 0 : i32
    return %c0_i32, %c0_i32_0 : i32, i32
  }
  func.func @transform_4(%arg0: i32) -> (i32, i32) {
    %c0_i32 = arith.constant 0 : i32
    %c0_i32_0 = arith.constant 0 : i32
    %c0_i32_1 = arith.constant 0 : i32
    return %c0_i32, %c0_i32_0 : i32, i32
  }
  func.func @transform_5(%arg0: i32) -> (i32, i32) {
    %c0_i32 = arith.constant 0 : i32
    %c0_i32_0 = arith.constant 0 : i32
    %c0_i32_1 = arith.constant 0 : i32
    return %c0_i32, %c0_i32_0 : i32, i32
  }
  func.func @transform_6(%arg0: i32) -> (i32, i32) {
    %c0_i32 = arith.constant 0 : i32
    %c0_i32_0 = arith.constant 0 : i32
    %c0_i32_1 = arith.constant 0 : i32
    return %c0_i32, %c0_i32_0 : i32, i32
  }
  func.func @transform_7(%arg0: i32) -> (i32, i32) {
    %c0_i32 = arith.constant 0 : i32
    %c0_i32_0 = arith.constant 0 : i32
    return %arg0, %c0_i32 : i32, i32
  }
}

</mosaic_0001>

<bundles_post_ra>
// kernel: tpu_custom_call.1
= control target key start
LH: loop header
LB: loop body
LE: loop exit
PB: predicated region body
PF: predicated region fallthrough
CT: control target
= control target key end

     0   :  { %12 = vsyncpa [#allocation3], 0  ;;  %s866_s0 = inlined_call_operand.vmem [shape: f32[16,32], index: 0, kind: input, shape index: {}]   ;;  %s867_s1 = inlined_call_operand.vmem [shape: f32[1,32], index: 1, kind: input, shape index: {}]   ;;  %s868_s2 = inlined_call_operand.vmem [shape: f32[1,32], index: 2, kind: input, shape index: {}]   ;;  %s869_s3 = inlined_call_operand.vmem [shape: bf16[32,128], index: 3, kind: input, shape index: {}]   ;;  %s870_s4 = inlined_call_operand.vmem [shape: f32[1,128], index: 4, kind: input, shape index: {}]   ;;  %s871_s5 = inlined_call_operand.vmem [shape: bf16[128,32], index: 5, kind: input, shape index: {}]   ;;  %s872_s6 = inlined_call_operand.vmem [shape: f32[1,32], index: 6, kind: input, shape index: {}]   ;;  %s873_s7 = inlined_call_operand.hbm [shape: f32[16,32], index: 7, kind: output, shape index: {}]  }
   0x1   :  { %14 = vsyncpa [#allocation3 + $0x1], 0  ;;  %s728_s24 = smov 0   ;;  %s730_s25 = smov 0  }
   0x2   :  { %s732_s26 = smov 0   ;;  %s734_s27 = smov 0  }
   0x3 LB: > { %s749_s28 = sadd.s32 4294967295, %s686_s27   ;;  %s516_s29 = sadd.s32 4294967294, %s686_s27   ;;  %s686_s27 = sphi %s734_s27, %s879_s27   ;;  %s682_s26 = sphi %s732_s26, %s878_s26   ;;  %s678_s25 = sphi %s730_s25, %s877_s25   ;;  %s674_s24 = sphi %s728_s24, %s876_s24  }
   0x4   : > { %s753_s30 = sadd.s32 1, %s686_s27   ;;  %s179_s8 = sadd.s32 1, %s682_s26 }
   0x5   : > { %s176_s9 = ssub.s32 %s686_s27, %s753_s30  ;;  %p189_p0 = scmp.ne.s32.totalorder %s682_s26, %s678_s25 }
   0x6   : > { %p177_p1 = scmp.eq.s32.totalorder %s176_s9, 0  ;;  %p190_p2 = scmp.eq.s32.totalorder %s749_s28, 1 }
   0x7   : > { %p195_p3 = scmp.ne.s32.totalorder %s678_s25, %s674_s24  ;;  %p196_p4 = scmp.eq.s32.totalorder %s516_s29, 1 }
   0x8   : > { %s764_s10 = scalar_select %p177_p1, %s682_s26, %s179_s8  }
   0x9   : > { %p766_p5 = por %p190_p2, %p189_p0  ;;  %p770_p6 = por %p196_p4, %p195_p3 }
   0xa   : > { %p519_p7 = scmp.ge.s32.totalorder %s686_s27, 1  ;;  %p239_p8 = scmp.lt.s32.totalorder %s686_s27, 3 }
   0xc   : > { %p240_p9 = pnand %p519_p7, %p239_p8 }
   0xd   : > { %p270_p10 = scmp.lt.s32.totalorder (!%p240_p9), %s749_s28, 1  ;;  %s267_s16 = sand.u32 (!%p240_p9), 1, %s678_s25  }
   0xe   : > { %243 = sbr.rel (%p240_p9) target bundleno = 468 (0x1d4), region = 48  ;;  %s564_s18 = sshll.u32 (!%p240_p9), %s749_s28, 3 }
   0xf   : > { %s452_s23 = scalar_lea.hbm (!%p240_p9), %s873_s7, %s564_s18 }
  0x10   : > { %s456_s9 = sshll.u32 (!%p240_p9), %s452_s23, 4  ;;  %s457_s9 = int_to_ptr.hbm [resolvable:$true] %s456_s9 }
  0x13   : > { %s271_s13 = scalar_select %p270_p10, %s749_s28, 1  ;;  %vm276_vm0 = vcmask 261120   ;;  %v568_v4 = vld [vmem:[%s869_s3 + $0x8] sm:$0xff]  ;;  %v567_v6 = vld [vmem:[%s869_s3] sm:$0xff]  ;;  %v576_v11 = vld [vmem:[%s871_s5 + $0x38] sm:$0xff] }
  0x14   : > { %341 = vmatpush.bf16.msra.mxu0 %v568_v4  ;;  %426 = vmatpush.bf16.msra.mxu1 %v576_v11  ;;  %v616_v21 = vld [vmem:[%s867_s1] ss:$0 sm:$0xff]  ;;  %v575_v28 = vld [vmem:[%s871_s5 + $0x30] sm:$0xff]  ;;  %v574_v29 = vld [vmem:[%s871_s5 + $0x28] sm:$0xff]  ;;  %s442_s28 = scalar_lea.sflag [#allocation3], %s267_s16 }
  0x15   : > { %s521_s14 = sshll.u32 %s271_s13, 3  ;;  %v617_v24 = vld [vmem:[%s868_s2] ss:$0 sm:$0xff]  ;;  %v572_v31 = vld [vmem:[%s871_s5 + $0x18] sm:$0xff]  ;;  %v571_v32 = vld [vmem:[%s871_s5 + $0x10] sm:$0xff]  ;;  %s638_s13 = sshra.s32 %s457_s9, 4  ;;  %s639_s13 = int_to_ptr.hbm [resolvable:$true] %s638_s13 }
  0x16   : > { %s273_s17 = scalar_lea.vmem %s866_s0, %s521_s14  ;;  %v573_v30 = vld [vmem:[%s871_s5 + $0x20] sm:$0xff]  ;;  %v570_v33 = vld [vmem:[%s871_s5 + $0x8] sm:$0xff]  ;;  %s640_s14 = scalar_lea.hbm %s639_s13, 8 }
  0x17   : > { %v781_v0 = vld [vmem:[%s273_s17] sm:$0xff]  ;;  %s520_s17 = sshll.u32 %s267_s16, 3  ;;  %p641_p11 = scmp.ne.s32.totalorder %s639_s13, %s640_s14 }
  0x18   : > { %v277_v1 = vsel %vm276_vm0, %v781_v0, 0.0  ;;  %v280_v2 = vmul.f32 %v781_v0, %v781_v0  ;;  %342 = vmatpush.bf16.msra.mxu0 %v567_v6  ;;  %427 = vmatpush.bf16.msra.mxu1 %v575_v28  ;;  %v569_v34 = vld [vmem:[%s871_s5] sm:$0xff]  ;;  %s269_s29 = scalar_lea.vmem [#allocation2], %s520_s17  ;;  %s644_s17 = scalar_lea.hbm %s873_s7, 16 }
  0x19   : > { %278 = vadd.xlane.f32.xlu0 %v277_v1  ;;  %v618_v35 = vld [vmem:[%s870_s4] ss:$0 sm:$0xff]  ;;  %s454_s8 = sshll.u32 %s269_s29, 4  ;;  %p642_p12 = pnand %p641_p11, %p766_p5  ;;  %s455_s8 = int_to_ptr.vmem [resolvable:$true] %s454_s8 }
  0x1a   : > { %v281_v3 = vsel %vm276_vm0, %v280_v2, 0.0  ;;  %v619_v49 = vld [vmem:[%s872_s6] ss:$0 sm:$0xff]  ;;  %p645_p0 = scmp.lt.s32.totalorder %s639_s13, %s873_s7  ;;  %p646_p1 = scmp.lt.s32.totalorder %s644_s17, %s640_s14 }
  0x1b   : > { %p643_p13 = pneg %p642_p12 }
  0x1c   : > { %428 = vmatpush.bf16.msra.mxu1 %v574_v29  ;;  %p647_p2 = por %p646_p1, %p645_p0 }
  0x1e   : > { %p648_p3 = pnand %p647_p2, %p643_p13 }
  0x20   : > { %429 = vmatpush.bf16.msra.mxu1 %v573_v30 }
  0x21   : > { %282 = vadd.xlane.f32.xlu0 %v281_v3 }
  0x24   : > { %430 = vmatpush.bf16.msra.mxu1 %v572_v31 }
  0x28   : > { %431 = vmatpush.bf16.msra.mxu1 %v571_v32 }
  0x2c   : > { %432 = vmatpush.bf16.msra.mxu1 %v570_v33 }
  0x30   : > { %433 = vmatpush.bf16.msra.mxu1 %v569_v34 }
  0x8c   : > { %v279_v5 = vpop.xlane.xlu0 %278 }
  0x8d   : > { %v284_v7 = vmul.f32 0.03125, %v279_v5 }
  0x8f   : > { %v286_v9 = vmul.f32 %v284_v7, %v284_v7  ;;  %v299_v20 = vsub.f32 %v781_v0, %v284_v7 }
  0x94   : > { %v283_v8 = vpop.xlane.xlu0 %282 }
  0x95   : > { %v285_v10 = vmul.f32 0.03125, %v283_v8 }
  0x97   : > { %v287_v12 = vsub.f32 %v285_v10, %v286_v9 }
  0x99   : > { %v288_v13 = vadd.f32 1e-05, %v287_v12 }
  0x9b   : > { %620 = vrsqrt.f32 %v288_v13  ;;  %vm295_vm2 = vweird.f32 %v288_v13 }
  0xa1   : > { %v621_v14 = vpop.eup %620 }
  0xa2   : > { %v290_v15 = vmul.f32 %v621_v14, %v288_v13  ;;  %vm296_vm1 = vweird.f32 %v621_v14 }
  0xa3   : > { %vm297_vm3 = vmor %vm295_vm2, %vm296_vm1 }
  0xa4   : > { %v291_v16 = vmul.f32 %v621_v14, %v290_v15 }
  0xa6   : > { %v292_v17 = vmul.f32 0.5, %v291_v16 }
  0xa8   : > { %v293_v18 = vsub.f32 1.5, %v292_v17 }
  0xaa   : > { %v294_v19 = vmul.f32 %v621_v14, %v293_v18 }
  0xac   : > { %v298_v22 = vsel %vm297_vm3, %v621_v14, %v294_v19 }
  0xad   : > { %v300_v23 = vmul.f32 %v299_v20, %v298_v22 }
  0xaf   : > { %v305_v25 = vmul.f32 %v616_v21, %v300_v23 }
  0xb1   : > { %v310_v26 = vadd.f32 %v617_v24, %v305_v25 }
  0xb3   : > { %v311_v27 = vpack.c.bf16 %v310_v26, %v310_v26 }
  0xb5   : > { %530 = vmatmul.msk.bf16.vlgmr.msra.gmra.mxu0 %vm276_vm0, %v311_v27 }
 0x132   : > { %v344_v36 = vpop.f32.mrf.mxu0 }
 0x133   : > { %v345_v37 = vadd.f32 %v618_v35, %v344_v36 }
 0x135   : > { %v348_v38 = vmul.f32 %v345_v37, %v345_v37 }
 0x137   : > { %v349_v39 = vmul.f32 %v348_v38, %v345_v37 }
 0x139   : > { %v350_v40 = vmul.f32 0.044715, %v349_v39 }
 0x13a   : > { %v346_v41 = vpop.f32.mrf.mxu0 }
 0x13b   : > { %v351_v42 = vadd.f32 %v350_v40, %v345_v37 }
 0x13d   : > { %v352_v43 = vmul.f32 0.7978846, %v351_v42 }
 0x13f   : > { %622 = vtanh.f32 %v352_v43 }
 0x145   : > { %v623_v44 = vpop.eup %622 }
 0x146   : > { %v354_v45 = vadd.f32 1.0, %v623_v44 }
 0x148   : > { %v355_v46 = vmul.f32 0.5, %v354_v45 }
 0x14a   : > { %v356_v47 = vmul.f32 %v355_v46, %v345_v37 }
 0x14c   : > { %v357_v48 = vpack.c.bf16 %v356_v47, %v356_v47 }
 0x14e   : > { %434 = vmatmul.bf16.vlgmr.msra.gmra.mxu1 %v357_v48 }
 0x1cb   : > { %v435_v50 = vpop.f32.mrf.mxu1 }
 0x1cc   : > { %v436_v51 = vadd.f32 %v619_v49, %v435_v50 }
 0x1ce   : > { %v439_v52 = vadd.f32 %v436_v51, %v781_v0 }
 0x1d0   : > { %440 = vst.msk [vmem:[%s269_s29] sm:$0xff] %vm276_vm0, %v439_v52 }
 0x1d1   : > { %651 = shalt.err (!%p648_p3)
}
 0x1d2   : > { %577 = dma.vmem_to_hbm [thread:$0]  (%p766_p5), %s455_s8, 128, %s457_s9, %s442_s28  }
 0x1d3   : > { %v437_v53 = vpop.f32.mrf.mxu1 }
 0x1d4 PF: > { %p583_p4 = scmp.ge.s32.totalorder %s686_s27, 2  ;;  %s468_s16 = sand.u32 1, %s674_s24  }
 0x1d5   : > { %s469_s21 = scalar_lea.sflag [#allocation3], %s468_s16 }
 0x1d6   : > { %p580_p7 = pnand %p583_p4, %p770_p6 }
 0x1d8   : > { %p581_p8 = pneg %p580_p7 }
 0x1da   : > { %669 = dma.done.wait (%p581_p8), %s469_s21, 128  }
 0x1db   : > { %671 = vsyncadd (%p581_p8), %s469_s21, 4294967168  ;;  %p17_p9 = scmp.ge.s32.totalorder %s753_s30, 4   ;;  %s876_s24 = smov %s678_s25 }
 0x1dc   : > { %s877_s25 = smov %s682_s26  ;;  %s878_s26 = smov %s764_s10 }
 0x1dd   : > { %s879_s27 = smov %s753_s30  ;;  %19 = sbr.rel (!%p17_p9) target bundleno = 3 (0x3), region = 83 }
 0x1e2   :  { %475 = vsyncpa [#allocation3], 1 }
 0x1e3   :  { %477 = vsyncpa [#allocation3 + $0x1], 1 }

// kernel: tpu_custom_call.1
= control target key start
LH: loop header
LB: loop body
LE: loop exit
PB: predicated region body
PF: predicated region fallthrough
CT: control target
= control target key end

     0   :  { %12 = vsyncpa [#allocation3], 0  ;;  %s866_s0 = inlined_call_operand.vmem [shape: f32[16,32], index: 0, kind: input, shape index: {}]   ;;  %s867_s1 = inlined_call_operand.vmem [shape: f32[1,32], index: 1, kind: input, shape index: {}]   ;;  %s868_s2 = inlined_call_operand.vmem [shape: f32[1,32], index: 2, kind: input, shape index: {}]   ;;  %s869_s3 = inlined_call_operand.vmem [shape: bf16[32,128], index: 3, kind: input, shape index: {}]   ;;  %s870_s4 = inlined_call_operand.vmem [shape: f32[1,128], index: 4, kind: input, shape index: {}]   ;;  %s871_s5 = inlined_call_operand.vmem [shape: bf16[128,32], index: 5, kind: input, shape index: {}]   ;;  %s872_s6 = inlined_call_operand.vmem [shape: f32[1,32], index: 6, kind: input, shape index: {}]   ;;  %s873_s7 = inlined_call_operand.hbm [shape: f32[16,32], index: 7, kind: output, shape index: {}]  }
   0x1   :  { %14 = vsyncpa [#allocation3 + $0x1], 0  ;;  %s728_s24 = smov 0   ;;  %s730_s25 = smov 0  }
   0x2   :  { %s732_s26 = smov 0   ;;  %s734_s27 = smov 0  }
   0x3 LB: > { %s749_s28 = sadd.s32 4294967295, %s686_s27   ;;  %s516_s29 = sadd.s32 4294967294, %s686_s27   ;;  %s686_s27 = sphi %s734_s27, %s879_s27   ;;  %s682_s26 = sphi %s732_s26, %s878_s26   ;;  %s678_s25 = sphi %s730_s25, %s877_s25   ;;  %s674_s24 = sphi %s728_s24, %s876_s24  }
   0x4   : > { %s753_s30 = sadd.s32 1, %s686_s27   ;;  %s179_s8 = sadd.s32 1, %s682_s26 }
   0x5   : > { %s176_s9 = ssub.s32 %s686_s27, %s753_s30  ;;  %p189_p0 = scmp.ne.s32.totalorder %s682_s26, %s678_s25 }
   0x6   : > { %p177_p1 = scmp.eq.s32.totalorder %s176_s9, 0  ;;  %p190_p2 = scmp.eq.s32.totalorder %s749_s28, 1 }
   0x7   : > { %p195_p3 = scmp.ne.s32.totalorder %s678_s25, %s674_s24  ;;  %p196_p4 = scmp.eq.s32.totalorder %s516_s29, 1 }
   0x8   : > { %s764_s10 = scalar_select %p177_p1, %s682_s26, %s179_s8  }
   0x9   : > { %p766_p5 = por %p190_p2, %p189_p0  ;;  %p770_p6 = por %p196_p4, %p195_p3 }
   0xa   : > { %p519_p7 = scmp.ge.s32.totalorder %s686_s27, 1  ;;  %p239_p8 = scmp.lt.s32.totalorder %s686_s27, 3 }
   0xc   : > { %p240_p9 = pnand %p519_p7, %p239_p8 }
   0xd   : > { %p270_p10 = scmp.lt.s32.totalorder (!%p240_p9), %s749_s28, 1  ;;  %s267_s16 = sand.u32 (!%p240_p9), 1, %s678_s25  }
   0xe   : > { %243 = sbr.rel (%p240_p9) target bundleno = 468 (0x1d4), region = 48  ;;  %s564_s18 = sshll.u32 (!%p240_p9), %s749_s28, 3 }
   0xf   : > { %s452_s23 = scalar_lea.hbm (!%p240_p9), %s873_s7, %s564_s18 }
  0x10   : > { %s456_s9 = sshll.u32 (!%p240_p9), %s452_s23, 4  ;;  %s457_s9 = int_to_ptr.hbm [resolvable:$true] %s456_s9 }
  0x13   : > { %s271_s13 = scalar_select %p270_p10, %s749_s28, 1  ;;  %vm276_vm0 = vcmask 261120   ;;  %v568_v4 = vld [vmem:[%s869_s3 + $0x8] sm:$0xff]  ;;  %v567_v6 = vld [vmem:[%s869_s3] sm:$0xff]  ;;  %v576_v11 = vld [vmem:[%s871_s5 + $0x38] sm:$0xff] }
  0x14   : > { %341 = vmatpush.bf16.msra.mxu0 %v568_v4  ;;  %426 = vmatpush.bf16.msra.mxu1 %v576_v11  ;;  %v616_v21 = vld [vmem:[%s867_s1] ss:$0 sm:$0xff]  ;;  %v575_v28 = vld [vmem:[%s871_s5 + $0x30] sm:$0xff]  ;;  %v574_v29 = vld [vmem:[%s871_s5 + $0x28] sm:$0xff]  ;;  %s442_s28 = scalar_lea.sflag [#allocation3], %s267_s16 }
  0x15   : > { %s521_s14 = sshll.u32 %s271_s13, 3  ;;  %v617_v24 = vld [vmem:[%s868_s2] ss:$0 sm:$0xff]  ;;  %v572_v31 = vld [vmem:[%s871_s5 + $0x18] sm:$0xff]  ;;  %v571_v32 = vld [vmem:[%s871_s5 + $0x10] sm:$0xff]  ;;  %s638_s13 = sshra.s32 %s457_s9, 4  ;;  %s639_s13 = int_to_ptr.hbm [resolvable:$true] %s638_s13 }
  0x16   : > { %s273_s17 = scalar_lea.vmem %s866_s0, %s521_s14  ;;  %v573_v30 = vld [vmem:[%s871_s5 + $0x20] sm:$0xff]  ;;  %v570_v33 = vld [vmem:[%s871_s5 + $0x8] sm:$0xff]  ;;  %s640_s14 = scalar_lea.hbm %s639_s13, 8 }
  0x17   : > { %v781_v0 = vld [vmem:[%s273_s17] sm:$0xff]  ;;  %s520_s17 = sshll.u32 %s267_s16, 3  ;;  %p641_p11 = scmp.ne.s32.totalorder %s639_s13, %s640_s14 }
  0x18   : > { %v277_v1 = vsel %vm276_vm0, %v781_v0, 0.0  ;;  %v280_v2 = vmul.f32 %v781_v0, %v781_v0  ;;  %342 = vmatpush.bf16.msra.mxu0 %v567_v6  ;;  %427 = vmatpush.bf16.msra.mxu1 %v575_v28  ;;  %v569_v34 = vld [vmem:[%s871_s5] sm:$0xff]  ;;  %s269_s29 = scalar_lea.vmem [#allocation2], %s520_s17  ;;  %s644_s17 = scalar_lea.hbm %s873_s7, 16 }
  0x19   : > { %278 = vadd.xlane.f32.xlu0 %v277_v1  ;;  %v618_v35 = vld [vmem:[%s870_s4] ss:$0 sm:$0xff]  ;;  %s454_s8 = sshll.u32 %s269_s29, 4  ;;  %p642_p12 = pnand %p641_p11, %p766_p5  ;;  %s455_s8 = int_to_ptr.vmem [resolvable:$true] %s454_s8 }
  0x1a   : > { %v281_v3 = vsel %vm276_vm0, %v280_v2, 0.0  ;;  %v619_v49 = vld [vmem:[%s872_s6] ss:$0 sm:$0xff]  ;;  %p645_p0 = scmp.lt.s32.totalorder %s639_s13, %s873_s7  ;;  %p646_p1 = scmp.lt.s32.totalorder %s644_s17, %s640_s14 }
  0x1b   : > { %p643_p13 = pneg %p642_p12 }
  0x1c   : > { %428 = vmatpush.bf16.msra.mxu1 %v574_v29  ;;  %p647_p2 = por %p646_p1, %p645_p0 }
  0x1e   : > { %p648_p3 = pnand %p647_p2, %p643_p13 }
  0x20   : > { %429 = vmatpush.bf16.msra.mxu1 %v573_v30 }
  0x21   : > { %282 = vadd.xlane.f32.xlu0 %v281_v3 }
  0x24   : > { %430 = vmatpush.bf16.msra.mxu1 %v572_v31 }
  0x28   : > { %431 = vmatpush.bf16.msra.mxu1 %v571_v32 }
  0x2c   : > { %432 = vmatpush.bf16.msra.mxu1 %v570_v33 }
  0x30   : > { %433 = vmatpush.bf16.msra.mxu1 %v569_v34 }
  0x8c   : > { %v279_v5 = vpop.xlane.xlu0 %278 }
  0x8d   : > { %v284_v7 = vmul.f32 0.03125, %v279_v5 }
  0x8f   : > { %v286_v9 = vmul.f32 %v284_v7, %v284_v7  ;;  %v299_v20 = vsub.f32 %v781_v0, %v284_v7 }
  0x94   : > { %v283_v8 = vpop.xlane.xlu0 %282 }
  0x95   : > { %v285_v10 = vmul.f32 0.03125, %v283_v8 }
  0x97   : > { %v287_v12 = vsub.f32 %v285_v10, %v286_v9 }
  0x99   : > { %v288_v13 = vadd.f32 1e-05, %v287_v12 }
  0x9b   : > { %620 = vrsqrt.f32 %v288_v13  ;;  %vm295_vm2 = vweird.f32 %v288_v13 }
  0xa1   : > { %v621_v14 = vpop.eup %620 }
  0xa2   : > { %v290_v15 = vmul.f32 %v621_v14, %v288_v13  ;;  %vm296_vm1 = vweird.f32 %v621_v14 }
  0xa3   : > { %vm297_vm3 = vmor %vm295_vm2, %vm296_vm1 }
  0xa4   : > { %v291_v16 = vmul.f32 %v621_v14, %v290_v15 }
  0xa6   : > { %v292_v17 = vmul.f32 0.5, %v291_v16 }
  0xa8   : > { %v293_v18 = vsub.f32 1.5, %v292_v17 }
  0xaa   : > { %v294_v19 = vmul.f32 %v621_v14, %v293_v18 }
  0xac   : > { %v298_v22 = vsel %vm297_vm3, %v621_v14, %v294_v19 }
  0xad   : > { %v300_v23 = vmul.f32 %v299_v20, %v298_v22 }
  0xaf   : > { %v305_v25 = vmul.f32 %v616_v21, %v300_v23 }
  0xb1   : > { %v310_v26 = vadd.f32 %v617_v24, %v305_v25 }
  0xb3   : > { %v311_v27 = vpack.c.bf16 %v310_v26, %v310_v26 }
  0xb5   : > { %530 = vmatmul.msk.bf16.vlgmr.msra.gmra.mxu0 %vm276_vm0, %v311_v27 }
 0x132   : > { %v344_v36 = vpop.f32.mrf.mxu0 }
 0x133   : > { %v345_v37 = vadd.f32 %v618_v35, %v344_v36 }
 0x135   : > { %v348_v38 = vmul.f32 %v345_v37, %v345_v37 }
 0x137   : > { %v349_v39 = vmul.f32 %v348_v38, %v345_v37 }
 0x139   : > { %v350_v40 = vmul.f32 0.044715, %v349_v39 }
 0x13a   : > { %v346_v41 = vpop.f32.mrf.mxu0 }
 0x13b   : > { %v351_v42 = vadd.f32 %v350_v40, %v345_v37 }
 0x13d   : > { %v352_v43 = vmul.f32 0.7978846, %v351_v42 }
 0x13f   : > { %622 = vtanh.f32 %v352_v43 }
 0x145   : > { %v623_v44 = vpop.eup %622 }
 0x146   : > { %v354_v45 = vadd.f32 1.0, %v623_v44 }
 0x148   : > { %v355_v46 = vmul.f32 0.5, %v354_v45 }
 0x14a   : > { %v356_v47 = vmul.f32 %v355_v46, %v345_v37 }
 0x14c   : > { %v357_v48 = vpack.c.bf16 %v356_v47, %v356_v47 }
 0x14e   : > { %434 = vmatmul.bf16.vlgmr.msra.gmra.mxu1 %v357_v48 }
 0x1cb   : > { %v435_v50 = vpop.f32.mrf.mxu1 }
 0x1cc   : > { %v436_v51 = vadd.f32 %v619_v49, %v435_v50 }
 0x1ce   : > { %v439_v52 = vadd.f32 %v436_v51, %v781_v0 }
 0x1d0   : > { %440 = vst.msk [vmem:[%s269_s29] sm:$0xff] %vm276_vm0, %v439_v52 }
 0x1d1   : > { %651 = shalt.err (!%p648_p3)
}
 0x1d2   : > { %577 = dma.vmem_to_hbm [thread:$0]  (%p766_p5), %s455_s8, 128, %s457_s9, %s442_s28  }
 0x1d3   : > { %v437_v53 = vpop.f32.mrf.mxu1 }
 0x1d4 PF: > { %p583_p4 = scmp.ge.s32.totalorder %s686_s27, 2  ;;  %s468_s16 = sand.u32 1, %s674_s24  }
 0x1d5   : > { %s469_s21 = scalar_lea.sflag [#allocation3], %s468_s16 }
 0x1d6   : > { %p580_p7 = pnand %p583_p4, %p770_p6 }
 0x1d8   : > { %p581_p8 = pneg %p580_p7 }
 0x1da   : > { %669 = dma.done.wait (%p581_p8), %s469_s21, 128  }
 0x1db   : > { %671 = vsyncadd (%p581_p8), %s469_s21, 4294967168  ;;  %p17_p9 = scmp.ge.s32.totalorder %s753_s30, 4   ;;  %s876_s24 = smov %s678_s25 }
 0x1dc   : > { %s877_s25 = smov %s682_s26  ;;  %s878_s26 = smov %s764_s10 }
 0x1dd   : > { %s879_s27 = smov %s753_s30  ;;  %19 = sbr.rel (!%p17_p9) target bundleno = 3 (0x3), region = 83 }
 0x1e2   :  { %475 = vsyncpa [#allocation3], 1 }
 0x1e3   :  { %477 = vsyncpa [#allocation3 + $0x1], 1 }

</bundles_post_ra>
